<compile_context>
chip_gen: v7x
topology: tpu7x:2x2x1
jax: 0.10.0
libtpu: 0.0.40
codegen_flags: <defaults>
</compile_context>

<pallas_src>
import functools

import jax
import jax.numpy as jnp
from jax.experimental import pallas as pl
from jax.experimental.pallas import tpu as pltpu


def _round_up(x, m):
    return ((x + m - 1) // m) * m


def _patch_embed_kernel(x_ref, w_ref, b_ref, o_ref):
    # x_ref: (TM, K_pad) patch tile - marches along M, double-buffered by
    # Pallas.  w_ref: (K_pad, E_pad) FULL weight - its block index is constant
    # across the 1-D M grid, so it is fetched from HBM once and stays
    # VMEM-resident for every M tile.  b_ref: (1, E_pad) bias (also resident).
    acc = jnp.dot(x_ref[...], w_ref[...], preferred_element_type=jnp.float32)
    o_ref[...] = (acc + b_ref[...].astype(jnp.float32)).astype(o_ref.dtype)


def patch_embed(x, weight, bias, patch_size, *, tm=1024,
                compute_dtype=jnp.bfloat16, out_dtype=None):
    """ViT patch embedding: Conv2d(k=s=patch_size) + flatten(2).transpose(1, 2).

    x: (B, C, H, W) NCHW; weight: (E, C, ph, pw) OIHW; bias: (E,).
    Returns (B, num_patches, E) in out_dtype (default: x.dtype).

    tm: tile size along the patch-row (M) axis; automatically clipped / shrunk
    to fit a conservative VMEM budget.  compute_dtype casts the matmul operands
    (bf16 default = MXU-native on v6e/v7x; pass None for exact f32).
    Accumulation is always f32 and the bias add is f32.
    """
    B, C, H, W = x.shape
    E = weight.shape[0]
    ph, pw = patch_size
    gh, gw = H // ph, W // pw
    num_patches = gh * gw
    K = C * ph * pw
    M = B * num_patches

    out_dtype = x.dtype if out_dtype is None else out_dtype

    # Glue: extract non-overlapping patches, flatten each in (C, ph, pw) order
    # (matches PyTorch's OIHW conv-weight layout).  allow_input_fusion below
    # lets XLA fold this transpose into the pallas_call's input DMA instead of
    # materializing an extra HBM copy of the image every call.
    xp = x.reshape(B, C, gh, ph, gw, pw)
    xp = jnp.transpose(xp, (0, 2, 4, 1, 3, 5))           # (B, gh, gw, C, ph, pw)
    xp = xp.reshape(M, K)

    w2 = weight.reshape(E, K).T                          # (K, E)
    b2 = bias.reshape(1, E).astype(jnp.float32)          # bias add stays f32

    if compute_dtype is not None:
        xp = xp.astype(compute_dtype)
        w2 = w2.astype(compute_dtype)

    in_itemsize = jnp.dtype(xp.dtype).itemsize
    out_itemsize = jnp.dtype(out_dtype).itemsize

    # Lane / MXU alignment.  Zero-pad columns do not change the result; padded
    # E columns are sliced off afterwards.  For standard ViT shapes (K = 768,
    # E = 768) these are no-ops, so no extra HBM copy is made.
    K_pad = _round_up(max(K, 128), 128)
    E_pad = _round_up(max(E, 128), 128)

    # M tiling: clip to the problem size, then shrink until the resident tile
    # set (Pallas double-buffers every operand, including the once-fetched
    # weight/bias) fits a budget that is safe on all generations (v5e scoped
    # default 16 MiB, v7x physical 64 MiB).
    tm = _round_up(min(tm, _round_up(M, 8)), 8)

    def vmem_bytes(tm_):
        return (2 * tm_ * K_pad * in_itemsize      # x tile (double-buffered)
                + 2 * K_pad * E_pad * in_itemsize  # weight (resident, 2x alloc)
                + 2 * E_pad * 4                    # bias (f32, resident)
                + 2 * tm_ * E_pad * out_itemsize)  # out tile (double-buffered)

    budget = 24 << 20
    while tm > 256 and vmem_bytes(tm) > budget:
        tm = _round_up(max(tm // 2, 256), 8)

    M_pad = _round_up(M, tm)

    def maybe_pad(a, rows, cols):
        if a.shape == (rows, cols):
            return a
        return jnp.pad(a, ((0, rows - a.shape[0]), (0, cols - a.shape[1])))

    xp_p = maybe_pad(xp, M_pad, K_pad)
    w_p = maybe_pad(w2, K_pad, E_pad)
    b_p = maybe_pad(b2, 1, E_pad)

    grid = (M_pad // tm,)   # 1-D over M; >= 2 tiles shard across v7x's 2 TCs.

    # Advisory estimate: useful flops (unpadded), and bytes that match the
    # actual schedule (x / weight / bias / out each touched exactly once).
    cost = pl.CostEstimate(
        flops=2 * M * K * E + M * E,
        transcendentals=0,
        bytes_accessed=(in_itemsize * (M_pad * K_pad + K_pad * E_pad)
                        + 4 * E_pad
                        + out_itemsize * (M_pad * E_pad)),
    )

    vmem_limit = int(min(64 << 20, max(vmem_bytes(tm) + (4 << 20), 16 << 20)))

    out = pl.pallas_call(
        _patch_embed_kernel,
        out_shape=jax.ShapeDtypeStruct((M_pad, E_pad), out_dtype),
        grid_spec=pltpu.PrefetchScalarGridSpec(
            num_scalar_prefetch=0,
            grid=grid,
            in_specs=[
                # Patch tile marches along M (double-buffered by Pallas).
                pl.BlockSpec((tm, K_pad), lambda i: (i, 0)),
                # Full weight / bias: constant block index -> fetched once,
                # VMEM-resident for the whole grid.
                pl.BlockSpec((K_pad, E_pad), lambda i: (0, 0)),
                pl.BlockSpec((1, E_pad), lambda i: (0, 0)),
            ],
            out_specs=pl.BlockSpec((tm, E_pad), lambda i: (i, 0)),
        ),
        compiler_params=pltpu.CompilerParams(
            dimension_semantics=("parallel",),
            # Allow the patch-extraction transpose to fuse into the input DMA.
            allow_input_fusion=[True, False, False],
            vmem_limit_bytes=vmem_limit,
        ),
        cost_estimate=cost,
    )(xp_p, w_p, b_p)

    out = out[:M, :E]
    return out.reshape(B, num_patches, E)


if __name__ == "__main__":
    # Small shapes consistent with the module's PatchEmbed forward:
    # img_size=16, patch_size=4, in_chans=4, embed_dim=32, batch=2
    B, C, H, W = 2, 4, 16, 16
    ph = pw = 4
    E = 32

    key = jax.random.PRNGKey(0)
    kx, kw, kb = jax.random.split(key, 3)
    x = jax.random.normal(kx, (B, C, H, W), dtype=jnp.float32)
    weight = jax.random.normal(kw, (E, C, ph, pw), dtype=jnp.float32) * 0.02
    bias = jax.random.normal(kb, (E,), dtype=jnp.float32) * 0.02

    # Pure-JAX conv reference (the PyTorch semantics).
    ref = jax.lax.conv_general_dilated(
        x, weight, window_strides=(ph, pw), padding="VALID",
        dimension_numbers=("NCHW", "OIHW", "NCHW"))
    ref = ref + bias.reshape(1, E, 1, 1)
    ref = ref.reshape(B, E, -1).transpose(0, 2, 1)   # flatten(2).transpose(1,2)

    n_patches = (H // ph) * (W // pw)

    # Exact f32 path (matches PyTorch conv semantics bit-for-bit up to
    # accumulation order).
    fn_f32 = jax.jit(functools.partial(patch_embed, patch_size=(ph, pw),
                                       compute_dtype=None))
    out_f32 = jax.block_until_ready(fn_f32(x, weight, bias))
    assert out_f32.shape == (B, n_patches, E)
    assert jnp.allclose(out_f32, ref, atol=1e-4, rtol=1e-4)

    # Default fast path: bf16 MXU operands, f32 accumulation + f32 bias add.
    fn_bf16 = jax.jit(functools.partial(patch_embed, patch_size=(ph, pw)))
    out_bf16 = jax.block_until_ready(fn_bf16(x, weight, bias))
    assert out_bf16.shape == (B, n_patches, E)
    assert jnp.allclose(out_bf16, ref, atol=3e-2, rtol=3e-2)

    print("KERNEL_OK")
</pallas_src>

<mosaic_0001>
module attributes {stable_mosaic.version = 11 : i64} {
  func.func @_patch_embed_kernel(%arg0: i32, %arg1: memref<32x128xf32, #tpu.memory_space<vmem>>, %arg2: memref<128x128xf32, #tpu.memory_space<vmem>>, %arg3: memref<1x128xf32, #tpu.memory_space<vmem>>, %arg4: memref<32x128xf32, #tpu.memory_space<vmem>>) attributes {dimension_semantics = [#tpu.dimension_semantics<parallel>], iteration_bounds = array<i64: 1>, scalar_prefetch = 0 : i64, scratch_operands = 0 : i64, tpu.core_type = #tpu.core_type<tc>, window_params = [{transform_indices = @transform_0, window_bounds = array<i64: 32, 128>}, {pipeline_mode = #tpu.pipeline_mode<synchronous>, transform_indices = @transform_1, window_bounds = array<i64: 128, 128>}, {pipeline_mode = #tpu.pipeline_mode<synchronous>, transform_indices = @transform_2, window_bounds = array<i64: 1, 128>}, {transform_indices = @transform_3, window_bounds = array<i64: 32, 128>}]} {
    %c0 = arith.constant 0 : index
    %c0_0 = arith.constant 0 : index
    %0 = vector.load %arg1[%c0, %c0_0] : memref<32x128xf32, #tpu.memory_space<vmem>>, vector<32x128xf32>
    %c0_1 = arith.constant 0 : index
    %c0_2 = arith.constant 0 : index
    %1 = vector.load %arg2[%c0_1, %c0_2] : memref<128x128xf32, #tpu.memory_space<vmem>>, vector<128x128xf32>
    %cst = arith.constant dense<0.000000e+00> : vector<32x128xf32>
    %2 = tpu.matmul %0, %1, %cst {dimension_numbers = #tpu.dot_dimension_numbers<[1], [0], [0], [1], [0, 0, 1, 1], [], []>} : vector<32x128xf32>, vector<128x128xf32>, vector<32x128xf32> -> vector<32x128xf32>
    %c0_3 = arith.constant 0 : index
    %c0_4 = arith.constant 0 : index
    %3 = vector.load %arg3[%c0_3, %c0_4] : memref<1x128xf32, #tpu.memory_space<vmem>>, vector<1x128xf32>
    %4 = vector.broadcast %3 : vector<1x128xf32> to vector<32x128xf32>
    %5 = arith.addf %2, %4 : vector<32x128xf32>
    %c0_5 = arith.constant 0 : index
    %c0_6 = arith.constant 0 : index
    %6 = vector.load %arg4[%c0_5, %c0_6] : memref<32x128xf32, #tpu.memory_space<vmem>>, vector<32x128xf32>
    tpu.vector_store %arg4[%c0_5, %c0_6], %5 {strides = array<i32>} : memref<32x128xf32, #tpu.memory_space<vmem>>, vector<32x128xf32>,
    return
  }
  func.func @transform_0(%arg0: i32) -> (i32, i32) {
    %c0_i32 = arith.constant 0 : i32
    %c0_i32_0 = arith.constant 0 : i32
    return %arg0, %c0_i32 : i32, i32
  }
  func.func @transform_1(%arg0: i32) -> (i32, i32) {
    %c0_i32 = arith.constant 0 : i32
    %c0_i32_0 = arith.constant 0 : i32
    %c0_i32_1 = arith.constant 0 : i32
    return %c0_i32, %c0_i32_0 : i32, i32
  }
  func.func @transform_2(%arg0: i32) -> (i32, i32) {
    %c0_i32 = arith.constant 0 : i32
    %c0_i32_0 = arith.constant 0 : i32
    %c0_i32_1 = arith.constant 0 : i32
    return %c0_i32, %c0_i32_0 : i32, i32
  }
  func.func @transform_3(%arg0: i32) -> (i32, i32) {
    %c0_i32 = arith.constant 0 : i32
    %c0_i32_0 = arith.constant 0 : i32
    return %arg0, %c0_i32 : i32, i32
  }
}

</mosaic_0001>

<bundles_post_ra>
// kernel: patch_embed.2
= control target key start
LH: loop header
LB: loop body
LE: loop exit
PB: predicated region body
PF: predicated region fallthrough
CT: control target
= control target key end

     0   :  { %s440_s0 = inlined_call_operand.vmem [shape: f32[128,128], index: 0, kind: input, shape index: {}]   ;;  %s441_s1 = inlined_call_operand.vmem [shape: f32[1,128], index: 1, kind: input, shape index: {}]   ;;  %s442_s2 = inlined_call_operand.vmem [shape: f32[32,64], index: 2, kind: input, shape index: {}]   ;;  %s443_s3 = inlined_call_operand.<no memory space> [shape: f32[], index: 3, kind: input, shape index: {}]   ;;  %s444_s4 = inlined_call_operand.hbm [shape: f32[32,128], index: 4, kind: output, shape index: {}]  }
   0x1   :  { %v355_v0 = vstv %s443_s3 }
   0x2   :  { %v59_v1 = vld [vmem:[%s440_s0] sm:$0xff]  ;;  %v60_v2 = vld [vmem:[%s440_s0 + $0x8] sm:$0xff]  ;;  %v61_v3 = vld [vmem:[%s440_s0 + $0x10] sm:$0xff]  ;;  %v18_v4 = vlaneseq }
   0x3   :  { %v249_v5 = vpack.c.bf16 %v60_v2, %v59_v1  ;;  %v62_v6 = vld [vmem:[%s440_s0 + $0x18] sm:$0xff]  ;;  %v63_v8 = vld [vmem:[%s440_s0 + $0x20] sm:$0xff]  ;;  %v64_v9 = vld [vmem:[%s440_s0 + $0x28] sm:$0xff] }
   0x4   :  { %v253_v7 = vpack.c.bf16 %v62_v6, %v61_v3  ;;  %v19_v10 = vand.u32 127, %v18_v4  ;;  %v257_v11 = vpack.c.bf16 %v64_v9, %v63_v8  ;;  %v17_v12 = vld [vmem:[%s442_s2] sm:$0xff]  ;;  %v188_v13 = vld [vmem:[%s442_s2 + $0x10] sm:$0xff]  ;;  %v66_v15 = vld [vmem:[%s440_s0 + $0x38] sm:$0xff] }
   0x5   :  { %250 = vmatprep.subr.bf16.mxu0 %v249_v5  ;;  %281 = vmatprep.subr.bf16.mxu1 %v249_v5  ;;  %v65_v14 = vld [vmem:[%s440_s0 + $0x30] sm:$0xff] }
   0x6   :  { %252 = vmatpush3.bf16.msra.mxu0 %v249_v5  ;;  %289 = vmatpush3.bf16.msra.mxu1 %v249_v5  ;;  %vm21_vm0 = vcmp.lt.s32.totalorder %v19_v10, 64 }
   0x7   :  { %254 = vmatprep.subr.bf16.mxu0 %v253_v7  ;;  %282 = vmatprep.subr.bf16.mxu1 %v253_v7  ;;  %v22_v16 = vsel %vm21_vm0, %v17_v12, %v355_v0  ;;  %v41_v17 = vsel %vm21_vm0, %v188_v13, %v355_v0 }
   0x8   :  { %10 = vsyncpa [#allocation8], 0  ;;  %243 = vmatprep.mubr.f32.mxu0 %v22_v16  ;;  %246 = vmatprep.mubr.f32.mxu1 %v41_v17  ;;  %v261_v18 = vpack.c.bf16 %v66_v15, %v65_v14  ;;  %v67_v19 = vld [vmem:[%s440_s0 + $0x40] sm:$0xff]  ;;  %v68_v20 = vld [vmem:[%s440_s0 + $0x48] sm:$0xff]  ;;  %s324_s30 = smov [#allocation7]  }
   0x9   :  { %v265_v21 = vpack.c.bf16 %v68_v20, %v67_v19  ;;  %v69_v22 = vld [vmem:[%s440_s0 + $0x50] sm:$0xff]  ;;  %v70_v23 = vld [vmem:[%s440_s0 + $0x58] sm:$0xff]  ;;  %v71_v25 = vld [vmem:[%s440_s0 + $0x60] sm:$0xff]  ;;  %s176_s5 = sshll.u32 %s324_s30, 4  ;;  %s177_s5 = int_to_ptr.vmem [resolvable:$true] %s176_s5 }
   0xa   :  { %256 = vmatpush3.bf16.msra.mxu0 %v253_v7  ;;  %290 = vmatpush3.bf16.msra.mxu1 %v253_v7  ;;  %v269_v24 = vpack.c.bf16 %v70_v23, %v69_v22  ;;  %v72_v26 = vld [vmem:[%s440_s0 + $0x68] sm:$0xff]  ;;  %v73_v28 = vld [vmem:[%s440_s0 + $0x70] sm:$0xff]  ;;  %v74_v29 = vld [vmem:[%s440_s0 + $0x78] sm:$0xff]  ;;  %p305_p1 = scmp.lt.s32.totalorder %s177_s5, %s177_s5 }
   0xb   :  { %258 = vmatprep.subr.bf16.mxu0 %v257_v11  ;;  %283 = vmatprep.subr.bf16.mxu1 %v257_v11  ;;  %v273_v27 = vpack.c.bf16 %v72_v26, %v71_v25  ;;  %v277_v30 = vpack.c.bf16 %v74_v29, %v73_v28  ;;  %v187_v31 = vld [vmem:[%s442_s2 + $0x8] sm:$0xff]  ;;  %v189_v32 = vld [vmem:[%s442_s2 + $0x18] sm:$0xff]  ;;  %v190_v35 = vld [vmem:[%s441_s1] ss:$0 sm:$0xff]  ;;  %s300_s2 = scalar_lea.vmem %s177_s5, 512 }
   0xc   :  { %v31_v33 = vsel %vm21_vm0, %v187_v31, %v355_v0  ;;  %v51_v34 = vsel %vm21_vm0, %v189_v32, %v355_v0  ;;  %p301_p0 = scmp.ne.s32.totalorder %s177_s5, %s300_s2  ;;  %p306_p2 = scmp.lt.s32.totalorder %s300_s2, %s300_s2 }
   0xe   :  { %260 = vmatpush3.bf16.msra.mxu0 %v257_v11  ;;  %291 = vmatpush3.bf16.msra.mxu1 %v257_v11  ;;  %p307_p3 = por %p306_p2, %p305_p1 }
   0xf   :  { %262 = vmatprep.subr.bf16.mxu0 %v261_v18  ;;  %284 = vmatprep.subr.bf16.mxu1 %v261_v18 }
  0x10   :  { %p308_p4 = pnand %p307_p3, %p301_p0 }
  0x12   :  { %264 = vmatpush3.bf16.msra.mxu0 %v261_v18  ;;  %292 = vmatpush3.bf16.msra.mxu1 %v261_v18 }
  0x13   :  { %266 = vmatprep.subr.bf16.mxu0 %v265_v21  ;;  %285 = vmatprep.subr.bf16.mxu1 %v265_v21 }
  0x16   :  { %268 = vmatpush3.bf16.msra.mxu0 %v265_v21  ;;  %293 = vmatpush3.bf16.msra.mxu1 %v265_v21 }
  0x17   :  { %270 = vmatprep.subr.bf16.mxu0 %v269_v24  ;;  %286 = vmatprep.subr.bf16.mxu1 %v269_v24 }
  0x1a   :  { %272 = vmatpush3.bf16.msra.mxu0 %v269_v24  ;;  %294 = vmatpush3.bf16.msra.mxu1 %v269_v24 }
  0x1b   :  { %274 = vmatprep.subr.bf16.mxu0 %v273_v27  ;;  %287 = vmatprep.subr.bf16.mxu1 %v273_v27 }
  0x1e   :  { %276 = vmatpush3.bf16.msra.mxu0 %v273_v27  ;;  %295 = vmatpush3.bf16.msra.mxu1 %v273_v27 }
  0x1f   :  { %278 = vmatprep.subr.bf16.mxu0 %v277_v30  ;;  %288 = vmatprep.subr.bf16.mxu1 %v277_v30 }
  0x22   :  { %280 = vmatpush3.bf16.msra.mxu0 %v277_v30  ;;  %296 = vmatpush3.bf16.msra.mxu1 %v277_v30 }
  0x25   :  { %244 = vmatmul.mubr.f32.vlgmr.msra.gmra.mrb[0].mxu0 %v31_v33  ;;  %247 = vmatmul.mubr.f32.vlgmr.msra.gmra.mrb[0].mxu1 %v51_v34 }
  0xf8   :  { %v245_v36 = vpop.f32.mrb[0].mxu0  ;;  %v248_v37 = vpop.f32.mrb[0].mxu1 }
  0xf9   :  { %v154_v38 = vadd.f32 %v245_v36, %v190_v35  ;;  %v164_v39 = vadd.f32 %v248_v37, %v190_v35  ;;  %v148_v40 = vpop.f32.mrb[1].mxu0  ;;  %v158_v41 = vpop.f32.mrb[1].mxu1 }
  0xfa   :  { %v149_v42 = vadd.f32 %v190_v35, %v148_v40  ;;  %v159_v43 = vadd.f32 %v190_v35, %v158_v41 }
  0xfb   :  { %168 = vst [vmem:[#allocation7 + $0x8] sm:$0xff] %v154_v38  ;;  %170 = vst [vmem:[#allocation7 + $0x18] sm:$0xff] %v164_v39 }
  0xfc   :  { %167 = vst [vmem:[#allocation7] sm:$0xff] %v149_v42  ;;  %169 = vst [vmem:[#allocation7 + $0x10] sm:$0xff] %v159_v43 }
  0xfd   :  { %311 = shalt.err (!%p308_p4)
}
  0xfe   :  { %s312_s7 = scalar_lea.hbm %s444_s4, 512 }
  0xff   :  { %p313_p5 = scmp.ne.s32.totalorder %s444_s4, %s312_s7  ;;  %p316_p6 = scmp.lt.u32.totalorder %s312_s7, %s444_s4 }
 0x101   :  { %p318_p7 = pnand %p316_p6, %p313_p5 }
 0x103   :  { %321 = shalt.err (!%p318_p7)
}
 0x104   :  { %s325_s12 = smov 128   ;;  %s326_s13 = smov 8  }
 0x105   :  { %182 = dma.vmem_to_hbm [thread:$0]  %s177_s5, 512, %s444_s4, [#allocation8], %s325_s12, %s325_s12, %s326_s13  }
 0x106   :  { %322 = dma.done.wait [#allocation8], 512  }
 0x107   :  { %323 = vsyncadd [#allocation8], 4294966784 }
 0x108   :  { %186 = vsyncpa [#allocation8], 1 }

</bundles_post_ra>
